<compile_context>
chip_gen: v5e
topology: v5e:2x2
jax: 0.10.0
libtpu: 0.0.40
codegen_flags: <defaults>
</compile_context>

<pallas_src>
import functools

import jax
import jax.numpy as jnp
from jax.experimental import pallas as pl
from jax.experimental.pallas import tpu as pltpu


def _fp_kernel(num_layers, xyz1_ref, xyz2_ref, p1_ref, p2_ref, *args):
    """Per (batch, N-tile) feature propagation.

    Kernel-side layout (channel-first, N on the lane axis):
      xyz1_ref: [3, TN]    xyz2_ref: [S, 3]
      p1_ref  : [D1, TN]   p2_ref  : [D2, S]
      weights : [H, Cin] bf16 (BN scale folded in), shifts [H, 1] f32
      out_ref : [H_last, TN]
    """
    out_ref = args[-1]
    args = args[:-1]
    w0a_ref, w0b_ref, t0_ref = args[0], args[1], args[2]
    later = []
    idx = 3
    for _ in range(1, num_layers):
        later.append((args[idx], args[idx + 1]))
        idx += 2

    xyz1 = xyz1_ref[...]                                   # [3, TN] f32
    xyz2 = xyz2_ref[...]                                   # [S, 3]  f32
    S = xyz2.shape[0]
    TN = xyz1.shape[1]

    # Squared pairwise distances [S, TN] on the VPU (a K=3 MXU matmul is pure
    # systolic fill/drain overhead and would also need an in-kernel transpose).
    work = jnp.zeros((S, TN), jnp.float32)
    for c in range(3):
        diff = xyz2[:, c:c + 1] - xyz1[c:c + 1, :]         # [S, TN]
        work = work + diff * diff

    # 3-NN selection with fused inverse-distance accumulation.  `m` is the
    # distance at the picked column, so the reciprocal is accumulated inside
    # the loop; no separate sel / dists / recip [S, TN] buffers stay live.
    row = jax.lax.broadcasted_iota(jnp.int32, (S, TN), 0)
    recip = jnp.zeros((S, TN), jnp.float32)
    for _ in range(3):
        m = jnp.min(work, axis=0, keepdims=True)                        # [1, TN]
        first = jnp.min(jnp.where(work <= m, row, S), axis=0, keepdims=True)
        pick = row == first                                             # [S, TN]
        recip = recip + jnp.where(pick, 1.0 / (m + 1e-8), 0.0)
        work = jnp.where(pick, jnp.float32(1e30), work)

    inv_norm = pl.reciprocal(jnp.sum(recip, axis=0, keepdims=True), approx=True)
    weight = (recip * inv_norm).astype(jnp.bfloat16)                    # [S, TN]

    # interpolated_points = points2 @ weight  (replaces gather + weighted sum).
    interp = jnp.dot(p2_ref[...].astype(jnp.bfloat16), weight,
                     preferred_element_type=jnp.float32)                # [D2, TN]

    # MLP layer 0: W0 @ concat([p1, interp]) == W0a @ p1 + W0b @ interp (exact,
    # avoids a sublane-axis concat copy inside the kernel).
    z = (jnp.dot(w0a_ref[...], p1_ref[...].astype(jnp.bfloat16),
                 preferred_element_type=jnp.float32)
         + jnp.dot(w0b_ref[...], interp.astype(jnp.bfloat16),
                   preferred_element_type=jnp.float32))
    h = jnp.maximum(z + t0_ref[...], 0.0)                               # [H0, TN]

    # Remaining MLP layers (conv1x1 + folded BN + ReLU).
    for w_ref, t_ref in later:
        z = jnp.dot(w_ref[...], h.astype(jnp.bfloat16),
                    preferred_element_type=jnp.float32)
        h = jnp.maximum(z + t_ref[...], 0.0)

    out_ref[...] = h


def init_params(key, in_channel, mlp):
    """Deterministic synthetic Conv1d + BatchNorm1d parameters."""
    params = []
    last = in_channel
    for out_ch in mlp:
        key, k1, k2, k3, k4, k5, k6 = jax.random.split(key, 7)
        params.append(dict(
            W=0.1 * jax.random.normal(k1, (out_ch, last), jnp.float32),
            b=0.1 * jax.random.normal(k2, (out_ch,), jnp.float32),
            gamma=1.0 + 0.1 * jax.random.normal(k3, (out_ch,), jnp.float32),
            beta=0.1 * jax.random.normal(k4, (out_ch,), jnp.float32),
            mean=0.1 * jax.random.normal(k5, (out_ch,), jnp.float32),
            var=jnp.abs(jax.random.normal(k6, (out_ch,), jnp.float32)) + 0.5,
        ))
        last = out_ch
    return params


def pointnet_feature_propagation(xyz1, xyz2, points1, points2, params,
                                 bn_eps=1e-5):
    """Pallas implementation of PointNetFeaturePropagation.forward (eval BN)."""
    B, _, N = xyz1.shape
    _, _, S = xyz2.shape
    D1 = points1.shape[1]
    assert S > 1, "S == 1 repeat branch not implemented"

    xyz1 = xyz1.astype(jnp.float32)                                   # [B, 3, N]
    xyz2_t = jnp.transpose(xyz2, (0, 2, 1)).astype(jnp.float32)       # [B, S, 3] (tiny)
    p1 = points1.astype(jnp.float32)                                  # [B, D1, N]
    p2 = points2.astype(jnp.float32)                                  # [B, D2, S]

    # Fold Conv1d bias + eval-mode BN into the weights (scale) and a shift.
    num_layers = len(params)
    flat_params = []
    hidden = []
    for i, lp in enumerate(params):
        H = lp["W"].shape[0]
        hidden.append(H)
        scale = lp["gamma"] / jnp.sqrt(lp["var"] + bn_eps)            # [H]
        shift = (lp["b"] - lp["mean"]) * scale + lp["beta"]            # [H]
        w = (lp["W"] * scale[:, None]).astype(jnp.bfloat16)            # [H, Cin]
        if i == 0:
            flat_params += [w[:, :D1], w[:, D1:]]                      # [H0,D1],[H0,D2]
        else:
            flat_params.append(w)                                      # [H, H_prev]
        flat_params.append(shift.reshape(H, 1).astype(jnp.float32))
    H_last = hidden[-1]

    # Tile N (the lane dim): keeps [S, TILE_N] temporaries small (fits v7x's
    # 64 MiB VMEM at production N/S), keeps deep pipelining, and gives the
    # megacore more than B grid points.  Fall back to full N when not 128-aligned.
    if N % 256 == 0:
        tile_n = 256
    elif N % 128 == 0:
        tile_n = 128
    else:
        tile_n = N
    n_tiles = N // tile_n

    def tiled_spec(d0):
        return pl.BlockSpec((pl.Squeezed(), d0, tile_n), lambda b, n: (b, 0, n))

    def whole_spec(d0, d1):
        return pl.BlockSpec((pl.Squeezed(), d0, d1), lambda b, n: (b, 0, 0))

    def const_spec(shape):
        return pl.BlockSpec(shape, lambda b, n: (0,) * len(shape))

    in_specs = [tiled_spec(3), whole_spec(S, 3), tiled_spec(D1),
                whole_spec(p2.shape[1], S)]
    in_specs += [const_spec(tuple(p.shape)) for p in flat_params]

    out = pl.pallas_call(
        functools.partial(_fp_kernel, num_layers),
        out_shape=jax.ShapeDtypeStruct((B, H_last, N), jnp.float32),
        grid=(B, n_tiles),
        in_specs=in_specs,
        out_specs=tiled_spec(H_last),
        compiler_params=pltpu.CompilerParams(
            dimension_semantics=("parallel", "parallel"),
            vmem_limit_bytes=32 * 1024 * 1024),
    )(xyz1, xyz2_t, p1, p2, *flat_params)

    return out                                                         # [B, H_last, N]


def _reference(xyz1, xyz2, points1, points2, params, bn_eps=1e-5):
    """Pure-JAX mirror of the PyTorch forward (eval-mode BN) for checking."""
    x1 = jnp.transpose(xyz1, (0, 2, 1))
    x2 = jnp.transpose(xyz2, (0, 2, 1))
    p1 = jnp.transpose(points1, (0, 2, 1))
    p2 = jnp.transpose(points2, (0, 2, 1))
    d = jnp.sum((x1[:, :, None, :] - x2[:, None, :, :]) ** 2, axis=-1)  # [B,N,S]
    idx = jnp.argsort(d, axis=-1)[:, :, :3]
    dd = jnp.take_along_axis(d, idx, axis=-1)
    recip = 1.0 / (dd + 1e-8)
    w = recip / jnp.sum(recip, axis=-1, keepdims=True)
    gathered = jax.vmap(lambda p, i: p[i])(p2, idx)                     # [B,N,3,D2]
    interp = jnp.sum(gathered * w[..., None], axis=2)                   # [B,N,D2]
    h = jnp.concatenate([p1, interp], axis=-1)
    for lp in params:
        scale = lp["gamma"] / jnp.sqrt(lp["var"] + bn_eps)
        shift = (lp["b"] - lp["mean"]) * scale + lp["beta"]
        h = jnp.maximum((h @ lp["W"].T) * scale + shift, 0.0)
    return jnp.transpose(h, (0, 2, 1))


if __name__ == "__main__":
    key = jax.random.PRNGKey(0)
    B, N, S, D1, D2 = 2, 16, 8, 4, 8
    mlp = [32, 16]

    k1, k2, k3, k4, kp = jax.random.split(key, 5)
    xyz1 = jax.random.normal(k1, (B, 3, N), jnp.float32)
    xyz2 = jax.random.normal(k2, (B, 3, S), jnp.float32)
    points1 = jax.random.normal(k3, (B, D1, N), jnp.float32)
    points2 = jax.random.normal(k4, (B, D2, S), jnp.float32)
    params = init_params(kp, D1 + D2, mlp)

    out = pointnet_feature_propagation(xyz1, xyz2, points1, points2, params)
    out = jax.block_until_ready(out)

    ref = _reference(xyz1, xyz2, points1, points2, params)
    assert out.shape == (B, mlp[-1], N), out.shape
    assert bool(jnp.all(jnp.isfinite(out)))
    assert bool(jnp.allclose(out, ref, rtol=2e-2, atol=2e-2))
    print("KERNEL_OK")
</pallas_src>

<mosaic_0001>
module attributes {stable_mosaic.version = 11 : i64} {
  func.func @_fp_kernel(%arg0: i32, %arg1: i32, %arg2: memref<1x3x16xf32, #tpu.memory_space<vmem>>, %arg3: memref<1x8x3xf32, #tpu.memory_space<vmem>>, %arg4: memref<1x4x16xf32, #tpu.memory_space<vmem>>, %arg5: memref<1x8x8xf32, #tpu.memory_space<vmem>>, %arg6: memref<32x4xbf16, #tpu.memory_space<vmem>>, %arg7: memref<32x8xbf16, #tpu.memory_space<vmem>>, %arg8: memref<32x1xf32, #tpu.memory_space<vmem>>, %arg9: memref<16x32xbf16, #tpu.memory_space<vmem>>, %arg10: memref<16x1xf32, #tpu.memory_space<vmem>>, %arg11: memref<1x16x16xf32, #tpu.memory_space<vmem>>) attributes {dimension_semantics = [#tpu.dimension_semantics<parallel>, #tpu.dimension_semantics<parallel>], iteration_bounds = array<i64: 2, 1>, scalar_prefetch = 0 : i64, scratch_operands = 0 : i64, tpu.core_type = #tpu.core_type<tc>, window_params = [{transform_indices = @transform_0, window_bounds = array<i64: 1, 3, 16>}, {transform_indices = @transform_1, window_bounds = array<i64: 1, 8, 3>}, {transform_indices = @transform_2, window_bounds = array<i64: 1, 4, 16>}, {transform_indices = @transform_3, window_bounds = array<i64: 1, 8, 8>}, {pipeline_mode = #tpu.pipeline_mode<synchronous>, transform_indices = @transform_4, window_bounds = array<i64: 32, 4>}, {pipeline_mode = #tpu.pipeline_mode<synchronous>, transform_indices = @transform_5, window_bounds = array<i64: 32, 8>}, {pipeline_mode = #tpu.pipeline_mode<synchronous>, transform_indices = @transform_6, window_bounds = array<i64: 32, 1>}, {pipeline_mode = #tpu.pipeline_mode<synchronous>, transform_indices = @transform_7, window_bounds = array<i64: 16, 32>}, {pipeline_mode = #tpu.pipeline_mode<synchronous>, transform_indices = @transform_8, window_bounds = array<i64: 16, 1>}, {transform_indices = @transform_9, window_bounds = array<i64: 1, 16, 16>}]} {
    %c0 = arith.constant 0 : index
    %c0_0 = arith.constant 0 : index
    %c0_1 = arith.constant 0 : index
    %0 = vector.load %arg2[%c0, %c0_0, %c0_1] : memref<1x3x16xf32, #tpu.memory_space<vmem>>, vector<1x3x16xf32>
    %1 = vector.shape_cast %0 : vector<1x3x16xf32> to vector<3x16xf32>
    %c0_2 = arith.constant 0 : index
    %c0_3 = arith.constant 0 : index
    %c0_4 = arith.constant 0 : index
    %2 = vector.load %arg3[%c0_2, %c0_3, %c0_4] : memref<1x8x3xf32, #tpu.memory_space<vmem>>, vector<1x8x3xf32>
    %3 = vector.shape_cast %2 : vector<1x8x3xf32> to vector<8x3xf32>
    %cst = arith.constant 0.000000e+00 : f32
    %4 = vector.broadcast %cst : f32 to vector<8x16xf32>
    %5 = vector.extract_strided_slice %3 {offsets = [0, 0], sizes = [8, 1], strides = [1, 1]} : vector<8x3xf32> to vector<8x1xf32>
    %6 = vector.extract_strided_slice %1 {offsets = [0, 0], sizes = [1, 16], strides = [1, 1]} : vector<3x16xf32> to vector<1x16xf32>
    %7 = vector.broadcast %5 : vector<8x1xf32> to vector<8x16xf32>
    %8 = vector.broadcast %6 : vector<1x16xf32> to vector<8x16xf32>
    %9 = arith.subf %7, %8 : vector<8x16xf32>
    %10 = arith.mulf %9, %9 : vector<8x16xf32>
    %11 = arith.addf %4, %10 : vector<8x16xf32>
    %12 = vector.extract_strided_slice %3 {offsets = [0, 1], sizes = [8, 1], strides = [1, 1]} : vector<8x3xf32> to vector<8x1xf32>
    %13 = vector.extract_strided_slice %1 {offsets = [1, 0], sizes = [1, 16], strides = [1, 1]} : vector<3x16xf32> to vector<1x16xf32>
    %14 = vector.broadcast %12 : vector<8x1xf32> to vector<8x16xf32>
    %15 = vector.broadcast %13 : vector<1x16xf32> to vector<8x16xf32>
    %16 = arith.subf %14, %15 : vector<8x16xf32>
    %17 = arith.mulf %16, %16 : vector<8x16xf32>
    %18 = arith.addf %11, %17 : vector<8x16xf32>
    %19 = vector.extract_strided_slice %3 {offsets = [0, 2], sizes = [8, 1], strides = [1, 1]} : vector<8x3xf32> to vector<8x1xf32>
    %20 = vector.extract_strided_slice %1 {offsets = [2, 0], sizes = [1, 16], strides = [1, 1]} : vector<3x16xf32> to vector<1x16xf32>
    %21 = vector.broadcast %19 : vector<8x1xf32> to vector<8x16xf32>
    %22 = vector.broadcast %20 : vector<1x16xf32> to vector<8x16xf32>
    %23 = arith.subf %21, %22 : vector<8x16xf32>
    %24 = arith.mulf %23, %23 : vector<8x16xf32>
    %25 = arith.addf %18, %24 : vector<8x16xf32>
    %26 = tpu.iota {dimensions = array<i32: 0>} : vector<8x16xi32>
    %cst_5 = arith.constant 0.000000e+00 : f32
    %27 = vector.broadcast %cst_5 : f32 to vector<8x16xf32>
    %cst_6 = arith.constant dense<0x7F800000> : vector<16xf32>
    %28 = vector.multi_reduction <minimumf>, %25, %cst_6 [0] : vector<8x16xf32> to vector<16xf32>
    %29 = vector.shape_cast %28 : vector<16xf32> to vector<1x16xf32>
    %30 = vector.broadcast %29 : vector<1x16xf32> to vector<8x16xf32>
    %31 = arith.cmpf ole, %25, %30 : vector<8x16xf32>
    %c8_i32 = arith.constant 8 : i32
    %32 = vector.broadcast %c8_i32 : i32 to vector<8x16xi32>
    %33 = arith.select %31, %26, %32 : vector<8x16xi1>, vector<8x16xi32>
    %cst_7 = arith.constant dense<2147483647> : vector<16xi32>
    %34 = vector.multi_reduction <minsi>, %33, %cst_7 [0] : vector<8x16xi32> to vector<16xi32>
    %35 = vector.shape_cast %34 : vector<16xi32> to vector<1x16xi32>
    %36 = vector.broadcast %35 : vector<1x16xi32> to vector<8x16xi32>
    %37 = arith.cmpi eq, %26, %36 : vector<8x16xi32>
    %cst_8 = arith.constant 9.99999993E-9 : f32
    %38 = vector.broadcast %cst_8 : f32 to vector<1x16xf32>
    %39 = arith.addf %29, %38 : vector<1x16xf32>
    %cst_9 = arith.constant 1.000000e+00 : f32
    %40 = vector.broadcast %cst_9 : f32 to vector<1x16xf32>
    %41 = arith.divf %40, %39 : vector<1x16xf32>
    %cst_10 = arith.constant 0.000000e+00 : f32
    %42 = vector.shape_cast %41 : vector<1x16xf32> to vector<1x16xf32>
    %43 = vector.broadcast %42 : vector<1x16xf32> to vector<8x16xf32>
    %44 = vector.broadcast %cst_10 : f32 to vector<8x16xf32>
    %45 = arith.select %37, %43, %44 : vector<8x16xi1>, vector<8x16xf32>
    %46 = arith.addf %27, %45 : vector<8x16xf32>
    %cst_11 = arith.constant 1.000000e+30 : f32
    %47 = vector.broadcast %cst_11 : f32 to vector<8x16xf32>
    %48 = arith.select %37, %47, %25 : vector<8x16xi1>, vector<8x16xf32>
    %cst_12 = arith.constant dense<0x7F800000> : vector<16xf32>
    %49 = vector.multi_reduction <minimumf>, %48, %cst_12 [0] : vector<8x16xf32> to vector<16xf32>
    %50 = vector.shape_cast %49 : vector<16xf32> to vector<1x16xf32>
    %51 = vector.broadcast %50 : vector<1x16xf32> to vector<8x16xf32>
    %52 = arith.cmpf ole, %48, %51 : vector<8x16xf32>
    %c8_i32_13 = arith.constant 8 : i32
    %53 = vector.broadcast %c8_i32_13 : i32 to vector<8x16xi32>
    %54 = arith.select %52, %26, %53 : vector<8x16xi1>, vector<8x16xi32>
    %cst_14 = arith.constant dense<2147483647> : vector<16xi32>
    %55 = vector.multi_reduction <minsi>, %54, %cst_14 [0] : vector<8x16xi32> to vector<16xi32>
    %56 = vector.shape_cast %55 : vector<16xi32> to vector<1x16xi32>
    %57 = vector.broadcast %56 : vector<1x16xi32> to vector<8x16xi32>
    %58 = arith.cmpi eq, %26, %57 : vector<8x16xi32>
    %cst_15 = arith.constant 9.99999993E-9 : f32
    %59 = vector.broadcast %cst_15 : f32 to vector<1x16xf32>
    %60 = arith.addf %50, %59 : vector<1x16xf32>
    %cst_16 = arith.constant 1.000000e+00 : f32
    %61 = vector.broadcast %cst_16 : f32 to vector<1x16xf32>
    %62 = arith.divf %61, %60 : vector<1x16xf32>
    %cst_17 = arith.constant 0.000000e+00 : f32
    %63 = vector.shape_cast %62 : vector<1x16xf32> to vector<1x16xf32>
    %64 = vector.broadcast %63 : vector<1x16xf32> to vector<8x16xf32>
    %65 = vector.broadcast %cst_17 : f32 to vector<8x16xf32>
    %66 = arith.select %58, %64, %65 : vector<8x16xi1>, vector<8x16xf32>
    %67 = arith.addf %46, %66 : vector<8x16xf32>
    %cst_18 = arith.constant 1.000000e+30 : f32
    %68 = vector.broadcast %cst_18 : f32 to vector<8x16xf32>
    %69 = arith.select %58, %68, %48 : vector<8x16xi1>, vector<8x16xf32>
    %cst_19 = arith.constant dense<0x7F800000> : vector<16xf32>
    %70 = vector.multi_reduction <minimumf>, %69, %cst_19 [0] : vector<8x16xf32> to vector<16xf32>
    %71 = vector.shape_cast %70 : vector<16xf32> to vector<1x16xf32>
    %72 = vector.broadcast %71 : vector<1x16xf32> to vector<8x16xf32>
    %73 = arith.cmpf ole, %69, %72 : vector<8x16xf32>
    %c8_i32_20 = arith.constant 8 : i32
    %74 = vector.broadcast %c8_i32_20 : i32 to vector<8x16xi32>
    %75 = arith.select %73, %26, %74 : vector<8x16xi1>, vector<8x16xi32>
    %cst_21 = arith.constant dense<2147483647> : vector<16xi32>
    %76 = vector.multi_reduction <minsi>, %75, %cst_21 [0] : vector<8x16xi32> to vector<16xi32>
    %77 = vector.shape_cast %76 : vector<16xi32> to vector<1x16xi32>
    %78 = vector.broadcast %77 : vector<1x16xi32> to vector<8x16xi32>
    %79 = arith.cmpi eq, %26, %78 : vector<8x16xi32>
    %cst_22 = arith.constant 9.99999993E-9 : f32
    %80 = vector.broadcast %cst_22 : f32 to vector<1x16xf32>
    %81 = arith.addf %71, %80 : vector<1x16xf32>
    %cst_23 = arith.constant 1.000000e+00 : f32
    %82 = vector.broadcast %cst_23 : f32 to vector<1x16xf32>
    %83 = arith.divf %82, %81 : vector<1x16xf32>
    %cst_24 = arith.constant 0.000000e+00 : f32
    %84 = vector.shape_cast %83 : vector<1x16xf32> to vector<1x16xf32>
    %85 = vector.broadcast %84 : vector<1x16xf32> to vector<8x16xf32>
    %86 = vector.broadcast %cst_24 : f32 to vector<8x16xf32>
    %87 = arith.select %79, %85, %86 : vector<8x16xi1>, vector<8x16xf32>
    %88 = arith.addf %67, %87 : vector<8x16xf32>
    %cst_25 = arith.constant dense<0.000000e+00> : vector<16xf32>
    %89 = vector.multi_reduction <add>, %88, %cst_25 [0] : vector<8x16xf32> to vector<16xf32>
    %90 = vector.shape_cast %89 : vector<16xf32> to vector<1x16xf32>
    %91 = tpu.reciprocal %90 {approx = true} : vector<1x16xf32> -> vector<1x16xf32>
    %92 = vector.broadcast %91 : vector<1x16xf32> to vector<8x16xf32>
    %93 = arith.mulf %88, %92 : vector<8x16xf32>
    %94 = arith.truncf %93 : vector<8x16xf32> to vector<8x16xbf16>
    %c0_26 = arith.constant 0 : index
    %c0_27 = arith.constant 0 : index
    %c0_28 = arith.constant 0 : index
    %95 = vector.load %arg5[%c0_26, %c0_27, %c0_28] : memref<1x8x8xf32, #tpu.memory_space<vmem>>, vector<1x8x8xf32>
    %96 = vector.shape_cast %95 : vector<1x8x8xf32> to vector<8x8xf32>
    %97 = arith.truncf %96 : vector<8x8xf32> to vector<8x8xbf16>
    %cst_29 = arith.constant dense<0.000000e+00> : vector<8x16xf32>
    %98 = tpu.matmul %97, %94, %cst_29 {dimension_numbers = #tpu.dot_dimension_numbers<[1], [0], [0], [1], [0, 0, 1, 1], [], []>} : vector<8x8xbf16>, vector<8x16xbf16>, vector<8x16xf32> -> vector<8x16xf32>
    %c0_30 = arith.constant 0 : index
    %c0_31 = arith.constant 0 : index
    %99 = vector.load %arg6[%c0_30, %c0_31] : memref<32x4xbf16, #tpu.memory_space<vmem>>, vector<32x4xbf16>
    %c0_32 = arith.constant 0 : index
    %c0_33 = arith.constant 0 : index
    %c0_34 = arith.constant 0 : index
    %100 = vector.load %arg4[%c0_32, %c0_33, %c0_34] : memref<1x4x16xf32, #tpu.memory_space<vmem>>, vector<1x4x16xf32>
    %101 = vector.shape_cast %100 : vector<1x4x16xf32> to vector<4x16xf32>
    %102 = arith.truncf %101 : vector<4x16xf32> to vector<4x16xbf16>
    %cst_35 = arith.constant dense<0.000000e+00> : vector<32x16xf32>
    %103 = tpu.matmul %99, %102, %cst_35 {dimension_numbers = #tpu.dot_dimension_numbers<[1], [0], [0], [1], [0, 0, 1, 1], [], []>} : vector<32x4xbf16>, vector<4x16xbf16>, vector<32x16xf32> -> vector<32x16xf32>
    %c0_36 = arith.constant 0 : index
    %c0_37 = arith.constant 0 : index
    %104 = vector.load %arg7[%c0_36, %c0_37] : memref<32x8xbf16, #tpu.memory_space<vmem>>, vector<32x8xbf16>
    %105 = arith.truncf %98 : vector<8x16xf32> to vector<8x16xbf16>
    %cst_38 = arith.constant dense<0.000000e+00> : vector<32x16xf32>
    %106 = tpu.matmul %104, %105, %cst_38 {dimension_numbers = #tpu.dot_dimension_numbers<[1], [0], [0], [1], [0, 0, 1, 1], [], []>} : vector<32x8xbf16>, vector<8x16xbf16>, vector<32x16xf32> -> vector<32x16xf32>
    %107 = arith.addf %103, %106 : vector<32x16xf32>
    %c0_39 = arith.constant 0 : index
    %c0_40 = arith.constant 0 : index
    %108 = vector.load %arg8[%c0_39, %c0_40] : memref<32x1xf32, #tpu.memory_space<vmem>>, vector<32x1xf32>
    %109 = vector.broadcast %108 : vector<32x1xf32> to vector<32x16xf32>
    %110 = arith.addf %107, %109 : vector<32x16xf32>
    %cst_41 = arith.constant 0.000000e+00 : f32
    %111 = vector.broadcast %cst_41 : f32 to vector<32x16xf32>
    %112 = arith.maximumf %110, %111 : vector<32x16xf32>
    %c0_42 = arith.constant 0 : index
    %c0_43 = arith.constant 0 : index
    %113 = vector.load %arg9[%c0_42, %c0_43] : memref<16x32xbf16, #tpu.memory_space<vmem>>, vector<16x32xbf16>
    %114 = arith.truncf %112 : vector<32x16xf32> to vector<32x16xbf16>
    %cst_44 = arith.constant dense<0.000000e+00> : vector<16x16xf32>
    %115 = tpu.matmul %113, %114, %cst_44 {dimension_numbers = #tpu.dot_dimension_numbers<[1], [0], [0], [1], [0, 0, 1, 1], [], []>} : vector<16x32xbf16>, vector<32x16xbf16>, vector<16x16xf32> -> vector<16x16xf32>
    %c0_45 = arith.constant 0 : index
    %c0_46 = arith.constant 0 : index
    %116 = vector.load %arg10[%c0_45, %c0_46] : memref<16x1xf32, #tpu.memory_space<vmem>>, vector<16x1xf32>
    %117 = vector.broadcast %116 : vector<16x1xf32> to vector<16x16xf32>
    %118 = arith.addf %115, %117 : vector<16x16xf32>
    %cst_47 = arith.constant 0.000000e+00 : f32
    %119 = vector.broadcast %cst_47 : f32 to vector<16x16xf32>
    %120 = arith.maximumf %118, %119 : vector<16x16xf32>
    %c0_48 = arith.constant 0 : index
    %c0_49 = arith.constant 0 : index
    %c0_50 = arith.constant 0 : index
    %121 = vector.load %arg11[%c0_48, %c0_49, %c0_50] : memref<1x16x16xf32, #tpu.memory_space<vmem>>, vector<1x16x16xf32>
    %122 = vector.shape_cast %121 : vector<1x16x16xf32> to vector<16x16xf32>
    %123 = vector.shape_cast %120 : vector<16x16xf32> to vector<1x16x16xf32>
    tpu.vector_store %arg11[%c0_48, %c0_49, %c0_50], %123 {strides = array<i32>} : memref<1x16x16xf32, #tpu.memory_space<vmem>>, vector<1x16x16xf32>,
    return
  }
  func.func @transform_0(%arg0: i32, %arg1: i32) -> (i32, i32, i32) {
    %c0_i32 = arith.constant 0 : i32
    %c0_i32_0 = arith.constant 0 : i32
    return %arg0, %c0_i32, %arg1 : i32, i32, i32
  }
  func.func @transform_1(%arg0: i32, %arg1: i32) -> (i32, i32, i32) {
    %c0_i32 = arith.constant 0 : i32
    %c0_i32_0 = arith.constant 0 : i32
    %c0_i32_1 = arith.constant 0 : i32
    return %arg0, %c0_i32, %c0_i32_0 : i32, i32, i32
  }
  func.func @transform_2(%arg0: i32, %arg1: i32) -> (i32, i32, i32) {
    %c0_i32 = arith.constant 0 : i32
    %c0_i32_0 = arith.constant 0 : i32
    return %arg0, %c0_i32, %arg1 : i32, i32, i32
  }
  func.func @transform_3(%arg0: i32, %arg1: i32) -> (i32, i32, i32) {
    %c0_i32 = arith.constant 0 : i32
    %c0_i32_0 = arith.constant 0 : i32
    %c0_i32_1 = arith.constant 0 : i32
    return %arg0, %c0_i32, %c0_i32_0 : i32, i32, i32
  }
  func.func @transform_4(%arg0: i32, %arg1: i32) -> (i32, i32) {
    %c0_i32 = arith.constant 0 : i32
    %c0_i32_0 = arith.constant 0 : i32
    %c0_i32_1 = arith.constant 0 : i32
    return %c0_i32, %c0_i32_0 : i32, i32
  }
  func.func @transform_5(%arg0: i32, %arg1: i32) -> (i32, i32) {
    %c0_i32 = arith.constant 0 : i32
    %c0_i32_0 = arith.constant 0 : i32
    %c0_i32_1 = arith.constant 0 : i32
    return %c0_i32, %c0_i32_0 : i32, i32
  }
  func.func @transform_6(%arg0: i32, %arg1: i32) -> (i32, i32) {
    %c0_i32 = arith.constant 0 : i32
    %c0_i32_0 = arith.constant 0 : i32
    %c0_i32_1 = arith.constant 0 : i32
    return %c0_i32, %c0_i32_0 : i32, i32
  }
  func.func @transform_7(%arg0: i32, %arg1: i32) -> (i32, i32) {
    %c0_i32 = arith.constant 0 : i32
    %c0_i32_0 = arith.constant 0 : i32
    %c0_i32_1 = arith.constant 0 : i32
    return %c0_i32, %c0_i32_0 : i32, i32
  }
  func.func @transform_8(%arg0: i32, %arg1: i32) -> (i32, i32) {
    %c0_i32 = arith.constant 0 : i32
    %c0_i32_0 = arith.constant 0 : i32
    %c0_i32_1 = arith.constant 0 : i32
    return %c0_i32, %c0_i32_0 : i32, i32
  }
  func.func @transform_9(%arg0: i32, %arg1: i32) -> (i32, i32, i32) {
    %c0_i32 = arith.constant 0 : i32
    %c0_i32_0 = arith.constant 0 : i32
    return %arg0, %c0_i32, %arg1 : i32, i32, i32
  }
}

</mosaic_0001>

<bundles_post_ra>
// kernel: tpu_custom_call.1
= control target key start
LH: loop header
LB: loop body
LE: loop exit
PB: predicated region body
PF: predicated region fallthrough
CT: control target
= control target key end

     0   :  { %14 = vsyncpa [#allocation3], 0  ;;  %s1341_s0 = inlined_call_operand.vmem [shape: f32[2,3,16], index: 0, kind: input, shape index: {}]   ;;  %s1342_s1 = inlined_call_operand.vmem [shape: f32[2,8,3], index: 1, kind: input, shape index: {}]   ;;  %s1343_s2 = inlined_call_operand.vmem [shape: f32[2,4,16], index: 2, kind: input, shape index: {}]   ;;  %s1344_s3 = inlined_call_operand.vmem [shape: f32[2,8,8], index: 3, kind: input, shape index: {}]   ;;  %s1345_s4 = inlined_call_operand.vmem [shape: bf16[32,4], index: 4, kind: input, shape index: {}]   ;;  %s1346_s5 = inlined_call_operand.vmem [shape: bf16[32,8], index: 5, kind: input, shape index: {}]   ;;  %s1347_s6 = inlined_call_operand.vmem [shape: f32[32,1], index: 6, kind: input, shape index: {}]   ;;  %s1348_s7 = inlined_call_operand.vmem [shape: bf16[16,32], index: 7, kind: input, shape index: {}]   ;;  %s1349_s8 = inlined_call_operand.vmem [shape: f32[16,1], index: 8, kind: input, shape index: {}]   ;;  %s1350_s9 = inlined_call_operand.hbm [shape: f32[2,16,16], index: 9, kind: output, shape index: {}]  }
   0x1   :  { %16 = vsyncpa [#allocation3 + $0x1], 0  ;;  %s1146_s30 = smov 0   ;;  %s1148_s10 = smov 0  }
   0x2   :  { %s1150_s11 = smov 0   ;;  %s1152_s12 = smov 0  }
   0x3   :  { %s1154_s13 = smov 0   ;;  %s1156_s14 = smov 0  }
   0x4 LB: > { %s890_s15 = sadd.s32 4294967295, %s1089_s14   ;;  %s891_s16 = sadd.s32 4294967294, %s1089_s14   ;;  %s1089_s14 = sphi %s1156_s14, %s22_s14   ;;  %s1085_s13 = sphi %s1154_s13, %s1359_s13   ;;  %s1081_s12 = sphi %s1152_s12, %s1358_s12   ;;  %s1077_s11 = sphi %s1150_s11, %s1357_s11   ;;  %s1073_s10 = sphi %s1148_s10, %s1356_s10   ;;  %s1069_s30 = sphi %s1146_s30, %s1355_s30  }
   0x5   : > { %s34_s17 = sadd.s32 1, %s1085_s13  ;;  %s256_s18 = sadd.s32 1, %s1077_s11 }
   0x6   : > { %p36_p0 = scmp.ge.s32.totalorder %s34_s17, 2  ;;  %p266_p1 = scmp.ne.s32.totalorder %s1077_s11, %s1073_s10 }
   0x7   : > { %p267_p2 = scmp.eq.s32.totalorder %s890_s15, 1  ;;  %p272_p3 = scmp.ne.s32.totalorder %s1073_s10, %s1069_s30 }
   0x8   : > { %s1361_s17 = smov (%p36_p0, %s34_s17), 0  ;;  %p273_p5 = scmp.eq.s32.totalorder %s891_s16, 1 }
   0x9   : > { %p1186_p4 = por %p267_p2, %p266_p1  ;;  %s251_s20 = ssub.s32 %s1085_s13, %s1361_s17 }
   0xa   : > { %p894_p6 = scmp.ge.s32.totalorder %s1089_s14, 1  ;;  %p254_p7 = scmp.eq.s32.totalorder %s251_s20, 0 }
   0xb   : > { %p1193_p8 = por %p273_p5, %p272_p3  ;;  %p340_p9 = scmp.lt.s32.totalorder %s1089_s14, 3 }
   0xc   : > { %s1199_s22 = scalar_select %p254_p7, %s1077_s11, %s256_s18  }
   0xd   : > { %p341_p10 = pnand %p894_p6, %p340_p9 }
   0xe   : > { %p393_p11 = scmp.lt.s32.totalorder (!%p341_p10), %s1081_s12, 1  ;;  %s390_s29 = sand.u32 (!%p341_p10), 1, %s1073_s10  }
   0xf   : > { %344 = sbr.rel (%p341_p10) target bundleno = 725 (0x2d5), region = 56 }
  0x14   : > { %v1091_v0 = vmov 0   ;;  %v1092_v1 = vmov 2   ;;  %s1203_s23 = scalar_select %p393_p11, %s1081_s12, 1  ;;  %v1093_v3 = vmov 1   ;;  %vm445_vm0 = vcmask 130048  }
  0x15   : > { %997 = vset.pattern.permute.xlu0 %v1091_v0  ;;  %999 = vset.pattern.permute.xlu1 %v1092_v1  ;;  %v443_v23 = vlaneseq }
  0x16   : > { %1001 = vset.pattern.permute.xlu2 %v1091_v0  ;;  %s897_s24 = sshll.u32 %s1203_s23, 3  ;;  %s896_s28 = sshll.u32 %s1203_s23, 2 }
  0x17   : > { %s403_s27 = scalar_lea.vmem %s1342_s1, %s897_s24  ;;  %s399_s16 = scalar_lea.vmem %s1341_s0, %s896_s28  ;;  %v1218_v26 = vshrl.u32 %v443_v23, 7 }
  0x18   : > { %v417_v2 = vld [vmem:[%s403_s27] sm:$0xff]  ;;  %s410_s25 = scalar_lea.vmem %s1343_s2, %s896_s28  ;;  %s414_s15 = scalar_lea.vmem %s1344_s3, %s897_s24 }
  0x19   : > { %420 = vperm.xlu0 %997, %v417_v2   ;;  %436 = vperm.xlu1 %999, %v417_v2   ;;  %v416_v5 = vld [vmem:[%s399_s16] sm:$0x7]  ;;  %s936_s16 = sshll.u32 %s1081_s12, 4  ;;  %s760_s12 = scalar_lea.sflag [#allocation3], %s390_s29 }
  0x1a   : > { %v423_v6 = vperm.slane %v416_v5, 0  ;;  %v439_v7 = vperm.slane %v416_v5, 2  ;;  %v431_v9 = vperm.slane %v416_v5, 1  ;;  %s772_s24 = scalar_lea.hbm %s1350_s9, %s936_s16  ;;  %s1031_s23 = scalar_lea.hbm %s1350_s9, 32 }
  0x1b   : > { %s775_s26 = sshll.u32 %s772_s24, 4  ;;  %s776_s26 = int_to_ptr.hbm [resolvable:$true] %s775_s26 }
  0x1c   : > { %s1025_s27 = sshra.s32 %s776_s26, 4  ;;  %s1026_s27 = int_to_ptr.hbm [resolvable:$true] %s1025_s27 }
  0x1d   : > { %s1027_s28 = scalar_lea.hbm %s1026_s27, 16  ;;  %p1032_p1 = scmp.lt.s32.totalorder %s1026_s27, %s1350_s9 }
  0x1e   : > { %p1028_p12 = scmp.ne.s32.totalorder %s1026_s27, %s1027_s28  ;;  %p1033_p2 = scmp.lt.s32.totalorder %s1031_s23, %s1027_s28 }
  0x20   : > { %p1029_p13 = pnand %p1028_p12, %p1186_p4  ;;  %p1034_p3 = por %p1033_p2, %p1032_p1 }
  0x21   : > { %998 = vset.pattern.permute.xlu0 %v1093_v3  ;;  %1000 = vset.pattern.permute.xlu1 %v1091_v0 }
  0x22   : > { %428 = vperm.xlu0 %998, %v417_v2   ;;  %p1030_p0 = pneg %p1029_p13 }
  0x24   : > { %p1035_p5 = pnand %p1034_p3, %p1030_p0 }
  0x2a   : > { %1002 = vset.pattern.permute.xlu0 %v1091_v0 }
  0x8b   : > { %v421_v4 = vpop.permute.xlu0 %420  ;;  %v437_v8 = vpop.permute.xlu1 %436 }
  0x8c   : > { %v424_v10 = vsub.f32 %v421_v4, %v423_v6  ;;  %v440_v11 = vsub.f32 %v437_v8, %v439_v7 }
  0x8e   : > { %v425_v14 = vmul.f32 %v424_v10, %v424_v10  ;;  %v441_v16 = vmul.f32 %v440_v11, %v440_v11 }
  0x94   : > { %v429_v12 = vpop.permute.xlu0 %428 }
  0x95   : > { %v432_v13 = vsub.f32 %v429_v12, %v431_v9 }
  0x97   : > { %v433_v15 = vmul.f32 %v432_v13, %v432_v13 }
  0x99   : > { %v434_v17 = vadd.f32 %v433_v15, %v425_v14 }
  0x9b   : > { %v442_v18 = vadd.f32 %v441_v16, %v434_v17 }
  0x9d   : > { %v446_v19 = vsel %vm445_vm0, %v442_v18, inf }
  0x9e   : > { %v447_v20 = vrot.slane %v446_v19, 4 }
  0xa0   : > { %v448_v21 = vmin.f32 %v446_v19, %v447_v20 }
  0xa2   : > { %v449_v22 = vrot.slane %v448_v21, 2 }
  0xa4   : > { %v450_v24 = vmin.f32 %v448_v21, %v449_v22 }
  0xa6   : > { %v451_v25 = vrot.slane %v450_v24, 1 }
  0xa8   : > { %v452_v27 = vmin.f32 %v450_v24, %v451_v25 }
  0xaa   : > { %vm453_vm1 = vcmp.le.f32.partialorder %v442_v18, %v452_v27  ;;  %v466_v52 = vadd.f32 1e-08, %v452_v27 }
  0xab   : > { %v454_v28 = vsel %vm453_vm1, %v1218_v26, 8 }
  0xac   : > { %v455_v29 = vsel %vm445_vm0, %v454_v28, 2147483647  ;;  %v476_v17 = vand.u32 2147483647, %v466_v52 }
  0xad   : > { %v456_v30 = vrot.slane %v455_v29, 4 }
  0xaf   : > { %vm457_vm2 = vcmp.lt.s32.totalorder %v455_v29, %v456_v30 }
  0xb0   : > { %v458_v31 = vsel %vm457_vm2, %v455_v29, %v456_v30  ;;  %vm472_vm2 = vweird.f32 %v466_v52 }
  0xb1   : > { %v459_v32 = vrot.slane %v458_v31, 2 }
  0xb3   : > { %vm460_vm3 = vcmp.lt.s32.totalorder %v458_v31, %v459_v32 }
  0xb4   : > { %v461_v33 = vsel %vm460_vm3, %v458_v31, %v459_v32 }
  0xb5   : > { %v462_v34 = vrot.slane %v461_v33, 1 }
  0xb7   : > { %vm463_vm4 = vcmp.lt.s32.totalorder %v461_v33, %v462_v34 }
  0xb8   : > { %v1222_v35 = vsel %vm463_vm4, %v461_v33, %v462_v34 }
  0xb9   : > { %vm465_vm5 = vcmp.eq.s32.totalorder %v1218_v26, %v1222_v35 }
  0xba   : > { %v484_v36 = vsel %vm465_vm5, 1e+30, %v442_v18  ;;  %v478_v18 = vand.u32 2147483648, %v466_v52 }
  0xbb   : > { %v485_v37 = vsel %vm445_vm0, %v484_v36, inf }
  0xbc   : > { %v486_v38 = vrot.slane %v485_v37, 4  ;;  %v479_v28 = vor.u32 1.1754944e-38, %v478_v18 }
  0xbe   : > { %v487_v39 = vmin.f32 %v485_v37, %v486_v38 }
  0xc0   : > { %v488_v40 = vrot.slane %v487_v39, 2 }
  0xc2   : > { %v489_v41 = vmin.f32 %v487_v39, %v488_v40 }
  0xc4   : > { %v490_v42 = vrot.slane %v489_v41, 1 }
  0xc6   : > { %v491_v43 = vmin.f32 %v489_v41, %v490_v42 }
  0xc8   : > { %vm492_vm6 = vcmp.le.f32.partialorder %v484_v36, %v491_v43  ;;  %v505_v49 = vadd.f32 1e-08, %v491_v43  ;;  %v599_v43 = vld [vmem:[%s410_s25] sm:$0xf] }
  0xc9   : > { %v493_v44 = vsel %vm492_vm6, %v1218_v26, 8 }
  0xca   : > { %v494_v45 = vsel %vm445_vm0, %v493_v44, 2147483647  ;;  %1003 = vrcp.f32 %v505_v49  ;;  %v517_v11 = vand.u32 2147483648, %v505_v49  ;;  %vm511_vm15 = vweird.f32 %v505_v49 }
  0xcb   : > { %v495_v46 = vrot.slane %v494_v45, 4  ;;  %1005 = vrcp.f32 %v466_v52  ;;  %v515_v14 = vand.u32 2147483647, %v505_v49 }
  0xcc   : > { %v518_v22 = vor.u32 1.1754944e-38, %v517_v11 }
  0xcd   : > { %vm496_vm7 = vcmp.lt.s32.totalorder %v494_v45, %v495_v46  ;;  %vm516_vm6 = vcmp.eq.f32.partialorder %v515_v14, 8.507059e+37 }
  0xce   : > { %v497_v47 = vsel %vm496_vm7, %v494_v45, %v495_v46  ;;  %vm477_vm7 = vcmp.eq.f32.partialorder %v476_v17, 8.507059e+37  ;;  %v600_v45 = vpack.c.bf16 %v599_v43, %v599_v43 }
  0xcf   : > { %v498_v48 = vrot.slane %v497_v47, 2 }
  0xd0   : > { %v1004_v57 = vpop.eup %1003 }
  0xd1   : > { %vm499_vm8 = vcmp.lt.s32.totalorder %v497_v47, %v498_v48  ;;  %v1006_v59 = vpop.eup %1005  ;;  %v507_v61 = vmul.f32 %v1004_v57, %v505_v49  ;;  %vm512_vm12 = vweird.f32 %v1004_v57 }
  0xd2   : > { %v500_v50 = vsel %vm499_vm8, %v497_v47, %v498_v48  ;;  %v468_v63 = vmul.f32 %v1006_v59, %v466_v52  ;;  %vm473_vm14 = vweird.f32 %v1006_v59  ;;  %vm513_vm1 = vmor %vm511_vm15, %vm512_vm12  ;;  %v931_v48 = vld [vmem:[%s1345_s4] sm:$0xff]  ;;  %vm578_vm15 = vcmask 1043456  }
  0xd3   : > { %v501_v51 = vrot.slane %v500_v50, 1  ;;  %v508_v1 = vsub.f32 1.0, %v507_v61  ;;  %vm1239_vm4 = vmor %vm472_vm2, %vm473_vm14  ;;  %v686_v61 = vld [vmem:[%s1347_s6 + $0x10] sm:$0xff]  ;;  %vm737_vm2 = vcmask 261120  }
  0xd4   : > { %v469_v3 = vsub.f32 1.0, %v468_v63  ;;  %700 = vperm.xlu1 %1000, %v686_v61   ;;  %v687_v63 = vld [vmem:[%s1347_s6 + $0x18] sm:$0xff] }
  0xd5   : > { %vm502_vm9 = vcmp.lt.s32.totalorder %v500_v50, %v501_v51  ;;  %v509_v5 = vmul.f32 %v1004_v57, %v508_v1  ;;  %705 = vperm.xlu2 %1001, %v687_v63  }
  0xd6   : > { %v503_v53 = vsel %vm502_vm9, %v500_v50, %v501_v51  ;;  %v470_v8 = vmul.f32 %v1006_v59, %v469_v3 }
  0xd7   : > { %vm504_vm10 = vcmp.eq.s32.totalorder %v1218_v26, %v503_v53  ;;  %v510_v10 = vadd.f32 %v1004_v57, %v509_v5  ;;  %v720_v5 = vld [vmem:[%s1349_s8] sm:$0xff] }
  0xd8   : > { %v523_v54 = vsel %vm504_vm10, 1e+30, %v484_v36  ;;  %v471_v13 = vadd.f32 %v1006_v59, %v470_v8 }
  0xd9   : > { %v524_v55 = vsel %vm445_vm0, %v523_v54, inf  ;;  %v514_v19 = vsel %vm513_vm1, %v1004_v57, %v510_v10  ;;  %vm574_vm1 = vcmask 64512  }
  0xda   : > { %v525_v56 = vrot.slane %v524_v55, 4  ;;  %v475_v24 = vsel %vm1239_vm4, %v1006_v59, %v471_v13  ;;  %v519_v29 = vsel %vm516_vm6, %v518_v22, %v514_v19 }
  0xdb   : > { %v480_v33 = vsel %vm477_vm7, %v479_v28, %v475_v24  ;;  %v521_v34 = vsel %vm504_vm10, %v519_v29, 0.0  ;;  %vm661_vm10 = vcmask 1041408  }
  0xdc   : > { %v526_v58 = vmin.f32 %v524_v55, %v525_v56  ;;  %v482_v39 = vsel %vm465_vm5, %v480_v33, 0.0  ;;  %v663_v47 = vsel %vm661_vm10, %v600_v45, 0  ;;  %vm654_vm5 = vcmask 31744   ;;  %v572_v56 = vld [vmem:[%s414_s15] sm:$0xff]  ;;  %s895_s15 = sshll.u32 %s390_s29, 4 }
  0xdd   : > { %v522_v41 = vadd.f32 %v521_v34, %v482_v39  ;;  %672 = vmatpush.bf16.msra.mxu2 %v663_v47  ;;  %v573_v59 = vpack.c.bf16 %v572_v56, %v572_v56  ;;  %s392_s18 = scalar_lea.vmem [#allocation2], %s895_s15 }
  0xde   : > { %v527_v60 = vrot.slane %v526_v58, 2  ;;  %s773_s25 = sshll.u32 %s392_s18, 4  ;;  %s774_s25 = int_to_ptr.vmem [resolvable:$true] %s773_s25 }
  0xe0   : > { %v528_v62 = vmin.f32 %v526_v58, %v527_v60  ;;  %919 = vmatmul.msk.bf16.vlgmr.msra.gmra.mxu2 %vm654_vm5, %v931_v48  ;;  %v932_v60 = vld [vmem:[%s1345_s4 + $0x8] sm:$0xff] }
  0xe2   : > { %v529_v0 = vrot.slane %v528_v62, 1 }
  0xe4   : > { %v530_v2 = vmin.f32 %v528_v62, %v529_v0  ;;  %v685_v62 = vld [vmem:[%s1347_s6 + $0x8] sm:$0xff]  ;;  %v684_v0 = vld [vmem:[%s1347_s6] sm:$0xff] }
  0xe5   : > { %695 = vperm.xlu1 %1000, %v685_v62   ;;  %690 = vperm.xlu2 %1001, %v684_v0  }
  0xe6   : > { %vm531_vm11 = vcmp.le.f32.partialorder %v523_v54, %v530_v2  ;;  %v544_v4 = vadd.f32 1e-08, %v530_v2 }
  0xe7   : > { %v532_v6 = vsel %vm531_vm11, %v1218_v26, 8 }
  0xe8   : > { %v533_v7 = vsel %vm445_vm0, %v532_v6, 2147483647  ;;  %1007 = vrcp.f32 %v544_v4  ;;  %v556_v30 = vand.u32 2147483648, %v544_v4  ;;  %v554_v32 = vand.u32 2147483647, %v544_v4 }
  0xe9   : > { %v534_v9 = vrot.slane %v533_v7, 4  ;;  %vm550_vm11 = vweird.f32 %v544_v4 }
  0xea   : > { %v557_v38 = vor.u32 1.1754944e-38, %v556_v30 }
  0xeb   : > { %vm535_vm13 = vcmp.lt.s32.totalorder %v533_v7, %v534_v9 }
  0xec   : > { %v536_v12 = vsel %vm535_vm13, %v533_v7, %v534_v9  ;;  %vm555_vm13 = vcmp.eq.f32.partialorder %v554_v32, 8.507059e+37  ;;  %v934_v7 = vld [vmem:[%s1346_s5 + $0x8] sm:$0xff] }
  0xed   : > { %v537_v15 = vrot.slane %v536_v12, 2  ;;  %724 = vperm.xlu2 %1001, %v720_v5  }
  0xee   : > { %v1008_v16 = vpop.eup %1007 }
  0xef   : > { %vm538_vm3 = vcmp.lt.s32.totalorder %v536_v12, %v537_v15  ;;  %v546_v20 = vmul.f32 %v1008_v16, %v544_v4  ;;  %vm551_vm9 = vweird.f32 %v1008_v16  ;;  %v933_v4 = vld [vmem:[%s1346_s5] sm:$0xff] }
  0xf0   : > { %v539_v23 = vsel %vm538_vm3, %v536_v12, %v537_v15  ;;  %vm552_vm12 = vmor %vm550_vm11, %vm551_vm9  ;;  %920 = vmatmul.msk.bf16.gmra.mxu2 %vm654_vm5, %v932_v60  ;;  %v721_v12 = vld [vmem:[%s1349_s8 + $0x8] sm:$0xff] }
  0xf1   : > { %v540_v25 = vrot.slane %v539_v23, 1  ;;  %v547_v27 = vsub.f32 1.0, %v546_v20  ;;  %729 = vperm.xlu0 %1002, %v721_v12  }
  0xf3   : > { %vm541_vm8 = vcmp.lt.s32.totalorder %v539_v23, %v540_v25  ;;  %v548_v31 = vmul.f32 %v1008_v16, %v547_v27 }
  0xf4   : > { %v542_v36 = vsel %vm541_vm8, %v539_v23, %v540_v25 }
  0xf5   : > { %v549_v37 = vadd.f32 %v1008_v16, %v548_v31  ;;  %vm543_vm14 = vcmp.eq.s32.totalorder %v1218_v26, %v542_v36 }
  0xf7   : > { %v553_v40 = vsel %vm552_vm12, %v1008_v16, %v549_v37  ;;  %v935_v37 = vld [vmem:[%s1348_s7] sm:$0xff] }
  0xf8   : > { %v558_v42 = vsel %vm555_vm13, %v557_v38, %v553_v40 }
  0xf9   : > { %v560_v44 = vsel %vm543_vm14, %v558_v42, 0.0 }
  0xfa   : > { %v561_v46 = vadd.f32 %v560_v44, %v522_v41 }
  0xfc   : > { %v562_v35 = vsel %vm445_vm0, %v561_v46, 0.0 }
  0xfd   : > { %v563_v49 = vrot.slane %v562_v35, 4 }
  0xff   : > { %v564_v50 = vadd.f32 %v563_v49, %v562_v35 }
 0x101   : > { %v565_v26 = vrot.slane %v564_v50, 2 }
 0x103   : > { %v566_v51 = vadd.f32 %v565_v26, %v564_v50 }
 0x105   : > { %v567_v52 = vrot.slane %v566_v51, 1 }
 0x107   : > { %v568_v53 = vadd.f32 %v567_v52, %v566_v51 }
 0x109   : > { %1009 = vrcp.f32 %v568_v53 }
 0x10f   : > { %v1010_v54 = vpop.eup %1009 }
 0x110   : > { %v570_v55 = vmul.f32 %v1010_v54, %v561_v46 }
 0x112   : > { %v571_v57 = vpack.c.bf16 %v570_v55, %v570_v55 }
 0x114   : > { %v580_v58 = vsel %vm578_vm15, %v571_v57, 0 }
 0x115   : > { %589 = vmatpush.bf16.msra.mxu0 %v580_v58 }
 0x118   : > { %900 = vmatmul.msk.bf16.vlgmr.msra.gmra.mxu0 %vm574_vm1, %v573_v59 }
 0x12f   : > { %v706_v15 = vpop.permute.xlu2 %705 }
 0x13f   : > { %v691_v25 = vpop.permute.xlu2 %690 }
 0x146   : > { %v701_v13 = vpop.permute.xlu1 %700 }
 0x147   : > { %v725_v38 = vpop.permute.xlu2 %724 }
 0x157   : > { %v696_v19 = vpop.permute.xlu1 %695 }
 0x163   : > { %v674_v8 = vpop.f32.mrf.mxu2  ;;  %v730_v42 = vpop.permute.xlu0 %729 }
 0x16b   : > { %v676_v10 = vpop.f32.mrf.mxu2 }
 0x173   : > { %v679_v14 = vpop.f32.mrf.mxu2 }
 0x17b   : > { %v681_v20 = vpop.f32.mrf.mxu2 }
 0x195   : > { %v591_v1 = vpop.f32.mrf.mxu0 }
 0x196   : > { %v605_v2 = vpack.c.bf16 %v591_v1, %v591_v1 }
 0x198   : > { %v623_v3 = vsel %vm578_vm15, %v605_v2, 0 }
 0x199   : > { %632 = vmatpush.bf16.msra.mxu1 %v623_v3 }
 0x19c   : > { %909 = vmatmul.msk.bf16.vlgmr.msra.gmra.mxu1 %vm574_vm1, %v933_v4 }
 0x19d   : > { %v593_v6 = vpop.f32.mrf.mxu0 }
 0x1ac   : > { %910 = vmatmul.msk.bf16.gmra.mxu1 %vm574_vm1, %v934_v7 }
 0x219   : > { %v634_v9 = vpop.f32.mrf.mxu1 }
 0x21a   : > { %v675_v22 = vadd.f32 %v674_v8, %v634_v9 }
 0x21c   : > { %v708_v29 = vadd.f32 %v691_v25, %v675_v22 }
 0x21e   : > { %v712_v34 = vmax.f32 %v708_v29, 0.0 }
 0x221   : > { %v636_v11 = vpop.f32.mrf.mxu1 }
 0x222   : > { %v677_v18 = vadd.f32 %v676_v10, %v636_v11 }
 0x224   : > { %v709_v27 = vadd.f32 %v696_v19, %v677_v18 }
 0x226   : > { %v713_v32 = vmax.f32 %v709_v27, 0.0 }
 0x228   : > { %v718_v36 = vpack.c.bf16 %v713_v32, %v712_v34 }
 0x229   : > { %v639_v16 = vpop.f32.mrf.mxu1 }
 0x22a   : > { %v680_v17 = vadd.f32 %v679_v14, %v639_v16 }
 0x22c   : > { %v710_v24 = vadd.f32 %v701_v13, %v680_v17 }
 0x22e   : > { %v714_v30 = vmax.f32 %v710_v24, 0.0 }
 0x231   : > { %v641_v21 = vpop.f32.mrf.mxu1 }
 0x232   : > { %v682_v23 = vadd.f32 %v681_v20, %v641_v21 }
 0x234   : > { %v711_v28 = vadd.f32 %v706_v15, %v682_v23 }
 0x236   : > { %v715_v31 = vmax.f32 %v711_v28, 0.0 }
 0x238   : > { %v719_v33 = vpack.c.bf16 %v715_v31, %v714_v30 }
 0x23a   : > { %747 = vmatpush.bf16.msra.mxu3 %v719_v33 }
 0x23e   : > { %748 = vmatpush.bf16.msra.mxu3 %v718_v36 }
 0x241   : > { %925 = vmatmul.msk.bf16.vlgmr.msra.gmra.mxu3 %vm737_vm2, %v935_v37 }
 0x2c4   : > { %v750_v39 = vpop.f32.mrf.mxu3 }
 0x2c5   : > { %v751_v40 = vadd.f32 %v750_v39, %v725_v38 }
 0x2c7   : > { %v755_v41 = vmax.f32 %v751_v40, 0.0 }
 0x2c9   : > { %757 = vst.msk [vmem:[%s392_s18] sm:$0xff] %vm445_vm0, %v755_v41 }
 0x2cc   : > { %v752_v43 = vpop.f32.mrf.mxu3 }
 0x2cd   : > { %v753_v44 = vadd.f32 %v752_v43, %v730_v42 }
 0x2cf   : > { %v756_v45 = vmax.f32 %v753_v44, 0.0 }
 0x2d1   : > { %758 = vst.msk [vmem:[%s392_s18 + $0x8] sm:$0xff] %vm445_vm0, %v756_v45 }
 0x2d2   : > { %1038 = shalt.err (!%p1035_p5)
}
 0x2d3   : > { %s1094_s29 = smov 128   ;;  %s1095_s18 = smov 8  }
 0x2d4   : > { %937 = dma.vmem_to_hbm [thread:$0]  (%p1186_p4), %s774_s25, 256, %s776_s26, %s760_s12, %s1094_s29, %s1094_s29, %s1095_s18  }
 0x2d5 PF: > { %p943_p6 = scmp.ge.s32.totalorder %s1089_s14, 2  ;;  %s790_s15 = sand.u32 1, %s1069_s30  }
 0x2d6   : > { %s791_s16 = scalar_lea.sflag [#allocation3], %s790_s15 }
 0x2d7   : > { %p940_p7 = pnand %p943_p6, %p1193_p8 }
 0x2d9   : > { %p941_p9 = pneg %p940_p7 }
 0x2db   : > { %1064 = dma.done.wait (%p941_p9), %s791_s16, 256  }
 0x2dc   : > { %1066 = vsyncadd (%p941_p9), %s791_s16, 4294967040  ;;  %s22_s14 = sadd.s32 1, %s1089_s14   ;;  %s1355_s30 = smov %s1073_s10 }
 0x2dd   : > { %p19_p10 = scmp.ge.s32.totalorder %s22_s14, 4   ;;  %s1356_s10 = smov %s1077_s11 }
 0x2de   : > { %s1357_s11 = smov %s1199_s22  ;;  %s1358_s12 = smov %s1085_s13 }
 0x2df   : > { %s1359_s13 = smov %s1361_s17  ;;  %21 = sbr.rel (!%p19_p10) target bundleno = 4 (0x4), region = 100 }
 0x2e4   :  { %797 = vsyncpa [#allocation3], 1 }
 0x2e5   :  { %799 = vsyncpa [#allocation3 + $0x1], 1 }

</bundles_post_ra>
